<compile_context>
chip_gen: v5e
topology: v5e:2x2
jax: 0.10.0
libtpu: 0.0.40
codegen_flags: <defaults>
</compile_context>

<pallas_src>
import functools

import jax
import jax.numpy as jnp
from jax.experimental import pallas as pl
from jax.experimental.pallas import tpu as pltpu


def _round_up(x, m):
    return (x + m - 1) // m * m


def label_smoothing_kernel(x_ref, tgt_ref, o_ref, *, smoothing, confidence,
                           padding_idx, vocab, n_rows, block_rows):
    i = pl.program_id(0)

    @pl.when(i == 0)
    def _():
        o_ref[...] = jnp.zeros_like(o_ref)

    x = x_ref[...].astype(jnp.float32)            # (TM, Vp)  log-probabilities
    tgt = tgt_ref[...]                            # (TM, 1)   int32 labels

    tm, vp = x.shape
    col = jax.lax.broadcasted_iota(jnp.int32, (tm, vp), 1)
    row = jax.lax.broadcasted_iota(jnp.int32, (tm, vp), 0) + i * block_rows

    smooth_val = smoothing / (vocab - 2)
    # Same op order as the PyTorch forward.
    td = jnp.where(col == tgt, confidence, smooth_val)   # scatter_(1, target, conf)
    td = jnp.where(col == padding_idx, 0.0, td)          # true_dist[:, pad] = 0
    td = jnp.where(tgt == padding_idx, 0.0, td)          # index_fill_ rows w/ pad target
    td = jnp.where(col < vocab, td, 0.0)                 # mask wrapper column padding
    td = jnp.where(row < n_rows, td, 0.0)                # mask wrapper row padding

    # KLDivLoss(reduction='sum'): td * (log td - x), with 0 * log(0) := 0.
    log_td = jnp.log(jnp.maximum(td, 1e-30))
    contrib = jnp.where(td > 0.0, td * (log_td - x), 0.0)

    o_ref[...] += jnp.sum(contrib)


def label_smoothing_loss(x, target, *, size, padding_idx, smoothing,
                         block_rows=256):
    """x: (N, V) float log-probs, target: (N,) int labels. Returns scalar loss."""
    n, v = x.shape
    assert v == size, "x.shape[1] must equal size"

    # Lane-dense columns (multiple of 128); row tile >= 8 and <= padded rows.
    vp = _round_up(v, 128)
    block_rows = min(block_rows, _round_up(n, 8))
    n_pad = _round_up(n, block_rows)

    x_p = jnp.pad(x.astype(jnp.float32), ((0, n_pad - n), (0, vp - v)))
    tgt_p = jnp.pad(target.astype(jnp.int32), (0, n_pad - n),
                    constant_values=padding_idx).reshape(n_pad, 1)

    grid = (n_pad // block_rows,)
    kernel = functools.partial(
        label_smoothing_kernel,
        smoothing=float(smoothing),
        confidence=float(1.0 - smoothing),
        padding_idx=int(padding_idx),
        vocab=int(v),
        n_rows=int(n),
        block_rows=int(block_rows),
    )

    out = pl.pallas_call(
        kernel,
        out_shape=jax.ShapeDtypeStruct((1, 1), jnp.float32),
        grid_spec=pltpu.PrefetchScalarGridSpec(
            num_scalar_prefetch=0,
            grid=grid,
            in_specs=[
                pl.BlockSpec((block_rows, vp), lambda i: (i, 0)),  # x tile
                pl.BlockSpec((block_rows, 1), lambda i: (i, 0)),   # targets
            ],
            out_specs=pl.BlockSpec((1, 1), lambda i: (0, 0)),      # scalar acc
        ),
        compiler_params=pltpu.CompilerParams(
            dimension_semantics=("arbitrary",),   # output is an accumulator
            vmem_limit_bytes=32 * 1024 * 1024,
        ),
        cost_estimate=pl.CostEstimate(
            flops=8 * n_pad * vp,
            transcendentals=n_pad * vp,
            bytes_accessed=x_p.size * 4 + tgt_p.size * 4 + 4,
        ),
    )(x_p, tgt_p)
    return out[0, 0]


def reference(x, target, *, size, padding_idx, smoothing):
    """Pure-JAX replica of the PyTorch forward (KLDivLoss(reduction='sum'))."""
    confidence = 1.0 - smoothing
    n, v = x.shape
    td = jnp.full((n, v), smoothing / (size - 2), dtype=jnp.float32)
    td = td.at[jnp.arange(n), target].set(confidence)
    td = td.at[:, padding_idx].set(0.0)
    td = jnp.where((target == padding_idx)[:, None], 0.0, td)
    safe_log = jnp.log(jnp.where(td > 0, td, 1.0))
    contrib = jnp.where(td > 0, td * (safe_log - x), 0.0)
    return jnp.sum(contrib)


if __name__ == "__main__":
    key = jax.random.PRNGKey(0)
    B, S, V = 2, 8, 32            # batch, seq, vocab  -> size = V
    N = B * S
    PADDING_IDX = 0
    SMOOTHING = 0.1

    k_logits, k_tgt = jax.random.split(key, 2)
    logits = jax.random.normal(k_logits, (N, V), dtype=jnp.float32)
    x = jax.nn.log_softmax(logits, axis=-1)           # KLDivLoss expects log-probs

    target = jax.random.randint(k_tgt, (N,), 1, V, dtype=jnp.int32)
    # Force a few padding targets to exercise the row-masking path.
    target = target.at[3].set(PADDING_IDX).at[10].set(PADDING_IDX)

    loss = label_smoothing_loss(x, target, size=V, padding_idx=PADDING_IDX,
                                smoothing=SMOOTHING)
    loss = jax.block_until_ready(loss)

    ref = reference(x, target, size=V, padding_idx=PADDING_IDX,
                    smoothing=SMOOTHING)
    assert jnp.allclose(loss, ref, atol=1e-3, rtol=1e-4), (
        f"mismatch: kernel={loss} ref={ref}")

    print("KERNEL_OK")
</pallas_src>

<mosaic_0001>
module attributes {stable_mosaic.version = 11 : i64} {
  func.func @label_smoothing_kernel(%arg0: i32, %arg1: memref<16x128xf32, #tpu.memory_space<vmem>>, %arg2: memref<16x1xi32, #tpu.memory_space<vmem>>, %arg3: memref<1x1xf32, #tpu.memory_space<vmem>>) attributes {dimension_semantics = [#tpu.dimension_semantics<arbitrary>], iteration_bounds = array<i64: 1>, scalar_prefetch = 0 : i64, scratch_operands = 0 : i64, tpu.core_type = #tpu.core_type<tc>, window_params = [{transform_indices = @transform_0, window_bounds = array<i64: 16, 128>}, {transform_indices = @transform_1, window_bounds = array<i64: 16, 1>}, {pipeline_mode = #tpu.pipeline_mode<synchronous>, transform_indices = @transform_2, window_bounds = array<i64: 1, 1>}]} {
    %c0_i32 = arith.constant 0 : i32
    %0 = arith.cmpi eq, %arg0, %c0_i32 : i32
    %1 = arith.extui %0 : i1 to i32
    %c0_i32_0 = arith.constant 0 : i32
    %2 = arith.cmpi ne, %1, %c0_i32_0 : i32
    scf.if %2 {
      %cst_20 = arith.constant 0.000000e+00 : f32
      %50 = vector.broadcast %cst_20 : f32 to vector<1x1xf32>
      %c0_21 = arith.constant 0 : index
      %c0_22 = arith.constant 0 : index
      %51 = vector.load %arg3[%c0_21, %c0_22] : memref<1x1xf32, #tpu.memory_space<vmem>>, vector<1x1xf32>
      tpu.vector_store %arg3[%c0_21, %c0_22], %50 {strides = array<i32>} : memref<1x1xf32, #tpu.memory_space<vmem>>, vector<1x1xf32>,
    } else {
    }
    %c0 = arith.constant 0 : index
    %c0_1 = arith.constant 0 : index
    %3 = vector.load %arg1[%c0, %c0_1] : memref<16x128xf32, #tpu.memory_space<vmem>>, vector<16x128xf32>
    %c0_2 = arith.constant 0 : index
    %c0_3 = arith.constant 0 : index
    %4 = vector.load %arg2[%c0_2, %c0_3] : memref<16x1xi32, #tpu.memory_space<vmem>>, vector<16x1xi32>
    %5 = tpu.iota {dimensions = array<i32: 1>} : vector<16x128xi32>
    %6 = tpu.iota {dimensions = array<i32: 0>} : vector<16x128xi32>
    %c16_i32 = arith.constant 16 : i32
    %7 = arith.muli %arg0, %c16_i32 : i32
    %8 = vector.broadcast %7 : i32 to vector<16x128xi32>
    %9 = arith.addi %6, %8 : vector<16x128xi32>
    %10 = vector.broadcast %4 : vector<16x1xi32> to vector<16x128xi32>
    %11 = arith.cmpi eq, %5, %10 : vector<16x128xi32>
    %cst = arith.constant 0.899999976 : f32
    %cst_4 = arith.constant 0.00333333341 : f32
    %12 = vector.broadcast %cst : f32 to vector<16x128xf32>
    %13 = vector.broadcast %cst_4 : f32 to vector<16x128xf32>
    %14 = arith.select %11, %12, %13 : vector<16x128xi1>, vector<16x128xf32>
    %c0_i32_5 = arith.constant 0 : i32
    %15 = vector.broadcast %c0_i32_5 : i32 to vector<16x128xi32>
    %16 = arith.cmpi eq, %5, %15 : vector<16x128xi32>
    %cst_6 = arith.constant 0.000000e+00 : f32
    %17 = vector.broadcast %cst_6 : f32 to vector<16x128xf32>
    %18 = arith.select %16, %17, %14 : vector<16x128xi1>, vector<16x128xf32>
    %c0_i32_7 = arith.constant 0 : i32
    %19 = vector.broadcast %c0_i32_7 : i32 to vector<16x1xi32>
    %20 = arith.cmpi eq, %4, %19 : vector<16x1xi32>
    %cst_8 = arith.constant 0.000000e+00 : f32
    %21 = vector.shape_cast %20 : vector<16x1xi1> to vector<16x1xi1>
    %22 = vector.broadcast %21 : vector<16x1xi1> to vector<16x128xi1>
    %23 = vector.broadcast %cst_8 : f32 to vector<16x128xf32>
    %24 = arith.select %22, %23, %18 : vector<16x128xi1>, vector<16x128xf32>
    %c32_i32 = arith.constant 32 : i32
    %25 = vector.broadcast %c32_i32 : i32 to vector<16x128xi32>
    %26 = arith.cmpi slt, %5, %25 : vector<16x128xi32>
    %cst_9 = arith.constant 0.000000e+00 : f32
    %27 = vector.broadcast %cst_9 : f32 to vector<16x128xf32>
    %28 = arith.select %26, %24, %27 : vector<16x128xi1>, vector<16x128xf32>
    %c16_i32_10 = arith.constant 16 : i32
    %29 = vector.broadcast %c16_i32_10 : i32 to vector<16x128xi32>
    %30 = arith.cmpi slt, %9, %29 : vector<16x128xi32>
    %cst_11 = arith.constant 0.000000e+00 : f32
    %31 = vector.broadcast %cst_11 : f32 to vector<16x128xf32>
    %32 = arith.select %30, %28, %31 : vector<16x128xi1>, vector<16x128xf32>
    %cst_12 = arith.constant 1.000000e-30 : f32
    %33 = vector.broadcast %cst_12 : f32 to vector<16x128xf32>
    %34 = arith.maximumf %32, %33 : vector<16x128xf32>
    %35 = math.log %34 : vector<16x128xf32>
    %cst_13 = arith.constant 0.000000e+00 : f32
    %36 = vector.broadcast %cst_13 : f32 to vector<16x128xf32>
    %37 = arith.cmpf ogt, %32, %36 : vector<16x128xf32>
    %38 = arith.subf %35, %3 : vector<16x128xf32>
    %39 = arith.mulf %32, %38 : vector<16x128xf32>
    %cst_14 = arith.constant 0.000000e+00 : f32
    %40 = vector.broadcast %cst_14 : f32 to vector<16x128xf32>
    %41 = arith.select %37, %39, %40 : vector<16x128xi1>, vector<16x128xf32>
    %c0_15 = arith.constant 0 : index
    %c0_16 = arith.constant 0 : index
    %42 = vector.load %arg3[%c0_15, %c0_16] : memref<1x1xf32, #tpu.memory_space<vmem>>, vector<1x1xf32>
    %43 = vector.shape_cast %41 : vector<16x128xf32> to vector<1x16x128xf32>
    %cst_17 = arith.constant dense<0.000000e+00> : vector<1xf32>
    %44 = vector.multi_reduction <add>, %43, %cst_17 [1, 2] : vector<1x16x128xf32> to vector<1xf32>
    %45 = vector.shape_cast %44 : vector<1xf32> to vector<1x1x1xf32>
    %46 = vector.extract %45[0, 0, 0] : f32 from vector<1x1x1xf32>
    %47 = vector.broadcast %46 : f32 to vector<1x1xf32>
    %48 = arith.addf %42, %47 : vector<1x1xf32>
    %c0_18 = arith.constant 0 : index
    %c0_19 = arith.constant 0 : index
    %49 = vector.load %arg3[%c0_18, %c0_19] : memref<1x1xf32, #tpu.memory_space<vmem>>, vector<1x1xf32>
    tpu.vector_store %arg3[%c0_18, %c0_19], %48 {strides = array<i32>} : memref<1x1xf32, #tpu.memory_space<vmem>>, vector<1x1xf32>,
    return
  }
  func.func @transform_0(%arg0: i32) -> (i32, i32) {
    %c0_i32 = arith.constant 0 : i32
    %c0_i32_0 = arith.constant 0 : i32
    return %arg0, %c0_i32 : i32, i32
  }
  func.func @transform_1(%arg0: i32) -> (i32, i32) {
    %c0_i32 = arith.constant 0 : i32
    %c0_i32_0 = arith.constant 0 : i32
    return %arg0, %c0_i32 : i32, i32
  }
  func.func @transform_2(%arg0: i32) -> (i32, i32) {
    %c0_i32 = arith.constant 0 : i32
    %c0_i32_0 = arith.constant 0 : i32
    %c0_i32_1 = arith.constant 0 : i32
    return %c0_i32, %c0_i32_0 : i32, i32
  }
}

</mosaic_0001>

<bundles_post_ra>
// kernel: tpu_custom_call.1
= control target key start
LH: loop header
LB: loop body
LE: loop exit
PB: predicated region body
PF: predicated region fallthrough
CT: control target
= control target key end

     0   :  { %v148_v1 = vmov 0   ;;  %s186_s0 = inlined_call_operand.vmem [shape: f32[16,128], index: 0, kind: input, shape index: {}]   ;;  %s187_s1 = inlined_call_operand.vmem [shape: s32[16,1], index: 1, kind: input, shape index: {}]   ;;  %s188_s2 = inlined_call_operand.hbm [shape: f32[1,1], index: 2, kind: output, shape index: {}]  }
   0x1   :  { %v20_v0 = vld [vmem:[%s187_s1] sm:$0xff]  ;;  %116 = vset.pattern.permute.xlu0 %v148_v1  ;;  %117 = vset.pattern.permute.xlu1 %v148_v1 }
   0x2   :  { %vm44_vm0 = vcmp.eq.s32.totalorder %v20_v0, 0 }
   0x3   :  { %7 = vsyncpa [#allocation3], 0  ;;  %32 = vperm.xlu0 %116, %v20_v0   ;;  %v46_v2 = vsel %vm44_vm0, 1, %v148_v1  ;;  %v21_v3 = vld [vmem:[%s187_s1 + $0x8] sm:$0xff]  ;;  %v22_v5 = vlaneseq  ;;  %v149_v9 = vmov 0.0033333334  }
   0x4   :  { %49 = vperm.xlu1 %117, %v46_v2   ;;  %vm45_vm1 = vcmp.eq.s32.totalorder %v21_v3, 0  ;;  %v18_v24 = vld [vmem:[%s186_s0] sm:$0xff]  ;;  %v19_v27 = vld [vmem:[%s186_s0 + $0x8] sm:$0xff]  ;;  %vm16_vm10 = vcmask 0   ;;  %v150_v35 = vmov 0.0   ;;  %s151_s0 = smov [#allocation2]  }
   0x5   :  { %v47_v4 = vsel %vm45_vm1, 1, %v148_v1  ;;  %v23_v6 = vand.u32 127, %v22_v5  ;;  %17 = vst.msk [vmem:[#allocation2] sm:$0x1] %vm16_vm10, %v150_v35  ;;  %s99_s16 = sshll.u32 %s151_s0, 4  ;;  %s101_s19 = sshll.u32 %s188_s2, 4  ;;  %s100_s16 = int_to_ptr.vmem [resolvable:$true] %s99_s16  ;;  %s102_s19 = int_to_ptr.hbm [resolvable:$true] %s101_s19 }
   0x7   :  { %vm41_vm2 = vcmp.eq.s32.totalorder %v23_v6, 0  ;;  %vm58_vm4 = vcmp.lt.s32.totalorder %v23_v6, 32 }
   0xb   :  { %35 = vperm.xlu0 %116, %v21_v3  }
   0xc   :  { %52 = vperm.xlu1 %117, %v47_v4   ;;  %v79_v43 = vld [vmem:[#allocation2] sm:$0x1] }
  0x75   :  { %v33_v7 = vpop.permute.xlu0 %32 }
  0x76   :  { %vm37_vm3 = vcmp.eq.s32.totalorder %v23_v6, %v33_v7  ;;  %v50_v8 = vpop.permute.xlu1 %49 }
  0x77   :  { %v39_v10 = vsel %vm37_vm3, 0.9, %v149_v9  ;;  %vm54_vm5 = vcmp.eq.s32.totalorder %v50_v8, 1 }
  0x78   :  { %v42_v11 = vsel %vm41_vm2, 0.0, %v39_v10 }
  0x79   :  { %v56_v12 = vsel %vm54_vm5, 0.0, %v42_v11 }
  0x7a   :  { %v59_v13 = vsel %vm58_vm4, %v56_v12, 0.0 }
  0x7b   :  { %v65_v14 = vmax.f32 %v59_v13, 1e-30  ;;  %vm71_vm8 = vcmp.gt.f32.partialorder %v59_v13, 0.0 }
  0x7d   :  { %118 = vlog2.f32 %v65_v14  ;;  %v36_v15 = vpop.permute.xlu0 %35 }
  0x7e   :  { %vm38_vm6 = vcmp.eq.s32.totalorder %v23_v6, %v36_v15  ;;  %v53_v16 = vpop.permute.xlu1 %52 }
  0x7f   :  { %v40_v17 = vsel %vm38_vm6, 0.9, %v149_v9  ;;  %vm55_vm7 = vcmp.eq.s32.totalorder %v53_v16, 1 }
  0x80   :  { %v43_v18 = vsel %vm41_vm2, 0.0, %v40_v17 }
  0x81   :  { %v57_v19 = vsel %vm55_vm7, 0.0, %v43_v18 }
  0x82   :  { %v60_v20 = vsel %vm58_vm4, %v57_v19, 0.0 }
  0x83   :  { %v119_v21 = vpop.eup %118  ;;  %v66_v22 = vmax.f32 %v60_v20, 1e-30  ;;  %vm72_vm9 = vcmp.gt.f32.partialorder %v60_v20, 0.0 }
  0x84   :  { %v68_v23 = vmul.f32 0.6931472, %v119_v21 }
  0x85   :  { %120 = vlog2.f32 %v66_v22 }
  0x86   :  { %v73_v25 = vsub.f32 %v68_v23, %v18_v24 }
  0x88   :  { %v75_v30 = vmul.f32 %v73_v25, %v59_v13 }
  0x8a   :  { %v77_v32 = vsel %vm71_vm8, %v75_v30, 0.0 }
  0x8b   :  { %v121_v26 = vpop.eup %120 }
  0x8c   :  { %v70_v28 = vmul.f32 0.6931472, %v121_v26 }
  0x8e   :  { %v74_v29 = vsub.f32 %v70_v28, %v19_v27 }
  0x90   :  { %v76_v31 = vmul.f32 %v74_v29, %v60_v20 }
  0x92   :  { %v78_v33 = vsel %vm72_vm9, %v76_v31, 0.0 }
  0x93   :  { %v80_v34 = vadd.f32 %v78_v33, %v77_v32 }
  0x95   :  { %81 = vadd.xlane.f32.xlu2 %v80_v34 }
 0x108   :  { %v82_v36 = vpop.xlane.xlu2 %81 }
 0x109   :  { %v83_v37 = vrot.slane %v82_v36, 4 }
 0x10b   :  { %v84_v38 = vadd.f32 %v83_v37, %v82_v36 }
 0x10d   :  { %v85_v39 = vrot.slane %v84_v38, 2 }
 0x10f   :  { %v86_v40 = vadd.f32 %v85_v39, %v84_v38 }
 0x111   :  { %v87_v41 = vrot.slane %v86_v40, 1 }
 0x113   :  { %v88_v42 = vadd.f32 %v87_v41, %v86_v40 }
 0x115   :  { %110 = vpush %v88_v42 }
 0x146   :  { %s111_s20 = spop %110 }
 0x147   :  { %v90_v44 = vstv %s111_s20 }
 0x148   :  { %v91_v45 = vadd.f32 %v90_v44, %v79_v43 }
 0x14a   :  { %93 = vst.msk [vmem:[#allocation2] sm:$0x1] %vm16_vm10, %v91_v45 }
 0x14b   :  { %104 = dma.vmem_to_hbm [thread:$0]  %s100_s16, 16, %s102_s19, [#allocation3]  }
 0x14c   :  { %146 = dma.done.wait [#allocation3], 16  }
 0x14d   :  { %147 = vsyncadd [#allocation3], 4294967280 }
 0x14e   :  { %109 = vsyncpa [#allocation3], 1 }

</bundles_post_ra>
